<compile_context>
chip_gen: v6e
topology: v6e:2x2x1
jax: 0.10.0
libtpu: 0.0.40
codegen_flags: <defaults>
</compile_context>

<pallas_src>
import inspect

import jax
import jax.numpy as jnp
from jax.experimental import pallas as pl
from jax.experimental.pallas import tpu as pltpu

LANE = 128


# ----------------------------- helpers ------------------------------------- #

def _round_up(n, m):
    return ((n + m - 1) // m) * m


def _cdiv(a, b):
    return -(-a // b)


def _sublane(dtype):
    # f32 -> 8, bf16 -> 16, int8/fp8 -> 32 rows per vreg tile.
    return max(8, 32 // jnp.dtype(dtype).itemsize)


_HAS_PIPELINE_MODE = (
    hasattr(pl, "Buffered")
    and "pipeline_mode" in inspect.signature(pl.BlockSpec).parameters
)


def _resident_spec(shape):
    """Whole-array, constant-index block: stays resident in VMEM across the
    batch grid. Single-buffered when supported so resident weights don't take
    2x VMEM (important on v7x's 64 MiB/TC)."""
    index_map = lambda *_: (0,) * len(shape)
    if _HAS_PIPELINE_MODE:
        return pl.BlockSpec(shape, index_map, pipeline_mode=pl.Buffered(1))
    return pl.BlockSpec(shape, index_map)


# ----------------------------- kernels ------------------------------------- #

def _finish(fused, b1_ref, w2_ref, b2_ref, o_ref):
    """Shared tail: split fused = [h_pre | residual] (lane-aligned), relu,
    psi_2 matmul, bias + residual add, lane-dense store."""
    hid_pad = b1_ref.shape[-1]                 # static python int, multiple of 128
    h = jnp.maximum(fused[:, :hid_pad] + b1_ref[...], 0.0)
    residual = fused[:, hid_pad:]
    out = jnp.dot(h.astype(w2_ref.dtype), w2_ref[...],
                  preferred_element_type=jnp.float32)
    o_ref[...] = (out + b2_ref[...] + residual).astype(o_ref.dtype)


def _kernel_with_action(x_ref, a_ref, wcx_ref, wca_ref,
                        b1_ref, w2_ref, b2_ref, o_ref):
    # concat([x, action]) @ [W1 | Wr]  ==  x @ Wcat_x + action @ Wcat_a
    fused = jnp.dot(x_ref[...], wcx_ref[...], preferred_element_type=jnp.float32)
    fused = fused + jnp.dot(a_ref[...], wca_ref[...],
                            preferred_element_type=jnp.float32)
    _finish(fused, b1_ref, w2_ref, b2_ref, o_ref)


def _kernel_no_action(x_ref, wc_ref, b1_ref, w2_ref, b2_ref, o_ref):
    fused = jnp.dot(x_ref[...], wc_ref[...], preferred_element_type=jnp.float32)
    _finish(fused, b1_ref, w2_ref, b2_ref, o_ref)


# ----------------------------- param prep (hoisted) ------------------------ #

def prepare_params(params, action_features=0, compute_dtype=None):
    """One-time kernel-weight preparation (NOT in the per-call forward path):
      * fuse [W1 | Wr] into one x-side weight (single wide MXU push per tile),
      * lane-pad hidden/out dims to multiples of 128 (lane-aligned split,
        lane-dense output store; zero padding keeps the math exact),
      * split the fused rows into (state, action) halves so concat([x, action])
        never materializes,
      * optionally downcast weights (e.g. bf16 for v5e HBM relief); biases stay
        f32 and all accumulation/bias/relu math stays f32 in-kernel.
    """
    w1, b1, w2, b2, wr = (params[k] for k in ("w1", "b1", "w2", "b2", "wr"))
    in_features, hidden = w1.shape
    out_features = w2.shape[1]
    hid_pad = _round_up(hidden, LANE)
    out_pad = _round_up(out_features, LANE)
    wdtype = jnp.dtype(compute_dtype) if compute_dtype is not None else w1.dtype

    w1p = jnp.zeros((in_features, hid_pad), wdtype).at[:, :hidden].set(
        w1.astype(wdtype))
    wrp = jnp.zeros((in_features, out_pad), wdtype).at[:, :out_features].set(
        wr.astype(wdtype))
    wcat = jnp.concatenate([w1p, wrp], axis=1)        # (in, hid_pad + out_pad)

    w2p = jnp.zeros((hid_pad, out_pad), wdtype).at[:hidden, :out_features].set(
        w2.astype(wdtype))
    b1p = jnp.zeros((1, hid_pad), jnp.float32).at[:, :hidden].set(
        b1.reshape(1, -1).astype(jnp.float32))
    b2p = jnp.zeros((1, out_pad), jnp.float32).at[:, :out_features].set(
        b2.reshape(1, -1).astype(jnp.float32))

    prepped = {
        "b1": b1p, "w2": w2p, "b2": b2p,
        "hid_pad": hid_pad, "out_pad": out_pad,
        "out_features": out_features, "in_features": in_features,
        "action_features": int(action_features),
    }
    if action_features > 0:
        f_state = in_features - action_features
        prepped["wcx"] = wcat[:f_state]               # (F_state, hid_pad+out_pad)
        prepped["wca"] = wcat[f_state:]               # (F_action, hid_pad+out_pad)
    else:
        prepped["wcx"] = wcat
        prepped["wca"] = None
    return prepped


# ----------------------------- forward ------------------------------------- #

def resblock_fc_forward(x, prepped, action=None, *, max_batch_tile=1024):
    """ResBlock_fc forward as a single pallas_call.

    x:       (B, F_state)
    action:  optional (B, F_action); concat is folded into the matmul.
    prepped: output of prepare_params (weights already fused / lane-padded).
    """
    B, f_state = x.shape
    dtype = x.dtype
    hid_pad, out_pad = prepped["hid_pad"], prepped["out_pad"]
    out_features = prepped["out_features"]

    if action is not None:
        f_action = action.shape[1]
        assert prepped["wca"] is not None and prepped["wca"].shape[0] == f_action, \
            "prepare_params was not built for this action width"
    else:
        f_action = 0
        assert prepped["wca"] is None, "prepare_params expects an action input"

    sub = _sublane(dtype)

    # --- batch tiling: minimal padding; >= 2 tiles when the batch allows so
    # the "parallel" batch axis can be sharded across v7x's two TensorCores.
    # TODO(synk): use pltpu.CORE_PARALLEL on v7x once safe to gate on chip type.
    n_tiles = max(1, _cdiv(B, max_batch_tile))
    if n_tiles == 1 and B >= 2 * sub:
        n_tiles = 2
    tb = _round_up(_cdiv(B, n_tiles), sub)

    # --- VMEM budgeting against the actual chip (128 MiB v5e/v6e, 64 MiB v7x),
    # counting the f32 intermediates (fused, h, out) that aren't BlockSpec bufs.
    try:
        vmem_cap = int(pltpu.get_tpu_info().vmem_capacity_bytes)
    except Exception:
        vmem_cap = 64 * 1024 * 1024            # conservative (v7x per-TC)
    vmem_limit = int(min(0.80 * vmem_cap, 100 * 1024 * 1024))

    itemsize = jnp.dtype(dtype).itemsize
    w_bufs = 1 if _HAS_PIPELINE_MODE else 2
    weight_bytes = w_bufs * (
        prepped["wcx"].size * prepped["wcx"].dtype.itemsize
        + (prepped["wca"].size * prepped["wca"].dtype.itemsize
           if prepped["wca"] is not None else 0)
        + prepped["w2"].size * prepped["w2"].dtype.itemsize
        + prepped["b1"].size * 4 + prepped["b2"].size * 4)

    def _tile_bytes(t):
        act = 2 * t * (f_state + f_action) * itemsize   # double-buffered inputs
        outb = 2 * t * out_pad * itemsize               # double-buffered output
        inter = t * (hid_pad + out_pad) * 4 + t * hid_pad * 4 + t * out_pad * 4
        return act + outb + inter

    budget = int(0.75 * vmem_limit) - weight_bytes
    while tb > sub and _tile_bytes(tb) > budget:
        tb = _round_up(tb // 2, sub)
    n_tiles = _cdiv(B, tb)
    padded_b = tb * n_tiles

    def pad_rows(arr):
        if arr.shape[0] == padded_b:
            return arr
        return jnp.pad(arr, ((0, padded_b - arr.shape[0]), (0, 0)))

    compiler_params = pltpu.CompilerParams(
        dimension_semantics=("parallel",),
        vmem_limit_bytes=vmem_limit,
    )
    out_shape = jax.ShapeDtypeStruct((padded_b, out_pad), dtype)
    out_spec = pl.BlockSpec((tb, out_pad), lambda i: (i, 0))

    if action is not None:
        xp, ap = pad_rows(x), pad_rows(action)
        out = pl.pallas_call(
            _kernel_with_action,
            out_shape=out_shape,
            grid_spec=pl.GridSpec(
                grid=(n_tiles,),
                in_specs=[
                    pl.BlockSpec((tb, f_state), lambda i: (i, 0)),
                    pl.BlockSpec((tb, f_action), lambda i: (i, 0)),
                    _resident_spec(prepped["wcx"].shape),
                    _resident_spec(prepped["wca"].shape),
                    _resident_spec(prepped["b1"].shape),
                    _resident_spec(prepped["w2"].shape),
                    _resident_spec(prepped["b2"].shape),
                ],
                out_specs=out_spec,
            ),
            compiler_params=compiler_params,
        )(xp, ap, prepped["wcx"], prepped["wca"],
          prepped["b1"], prepped["w2"], prepped["b2"])
    else:
        xp = pad_rows(x)
        out = pl.pallas_call(
            _kernel_no_action,
            out_shape=out_shape,
            grid_spec=pl.GridSpec(
                grid=(n_tiles,),
                in_specs=[
                    pl.BlockSpec((tb, f_state), lambda i: (i, 0)),
                    _resident_spec(prepped["wcx"].shape),
                    _resident_spec(prepped["b1"].shape),
                    _resident_spec(prepped["w2"].shape),
                    _resident_spec(prepped["b2"].shape),
                ],
                out_specs=out_spec,
            ),
            compiler_params=compiler_params,
        )(xp, prepped["wcx"], prepped["b1"], prepped["w2"], prepped["b2"])

    return out[:B, :out_features]


# ----------------------------- params / reference -------------------------- #

def _orthogonal(key, rows, cols):
    """Deterministic orthogonal init (matches nn.init.orthogonal_ semantics)."""
    a = jax.random.normal(key, (max(rows, cols), min(rows, cols)), jnp.float32)
    q, r = jnp.linalg.qr(a)
    q = q * jnp.sign(jnp.diagonal(r))
    if rows < cols:
        q = q.T
    return q[:rows, :cols]


def make_params(key, in_features, hidden_features, out_features):
    k1, k2, k3, k4, k5 = jax.random.split(key, 5)
    bound1 = 1.0 / jnp.sqrt(in_features)
    bound2 = 1.0 / jnp.sqrt(hidden_features)
    w1_t = jax.random.uniform(k1, (hidden_features, in_features), jnp.float32,
                              -bound1, bound1)
    b1 = jax.random.uniform(k2, (hidden_features,), jnp.float32, -bound1, bound1)
    w2_t = jax.random.uniform(k3, (out_features, hidden_features), jnp.float32,
                              -bound2, bound2)
    b2 = jax.random.uniform(k4, (out_features,), jnp.float32, -bound2, bound2)
    wr_t = _orthogonal(k5, out_features, in_features)   # residual W, no bias
    # Pre-transposed to (in, out) layout for row-major matmuls.
    return {
        "w1": w1_t.T,                  # (in, hidden)
        "b1": b1.reshape(1, -1),       # (1, hidden)
        "w2": w2_t.T,                  # (hidden, out)
        "b2": b2.reshape(1, -1),       # (1, out)
        "wr": wr_t.T,                  # (in, out)
    }


def _reference(x, params, action=None):
    if action is not None:
        x = jnp.concatenate([x, action], axis=1)
    residual = x @ params["wr"]
    h = jax.nn.relu(x @ params["w1"] + params["b1"])
    return h @ params["w2"] + params["b2"] + residual


# ----------------------------- test ----------------------------------------- #

if __name__ == "__main__":
    key = jax.random.PRNGKey(0)
    kx, ka, kp, kp2 = jax.random.split(key, 4)

    batch = 8
    state_features = 24
    action_features = 8
    in_features = state_features + action_features   # 32 after concat
    hidden_features = 32
    out_features = 16

    x = jax.random.normal(kx, (batch, state_features), jnp.float32)
    action = jax.random.normal(ka, (batch, action_features), jnp.float32)

    # Path 1: with action (concat folded into the fused matmul).
    params = make_params(kp, in_features, hidden_features, out_features)
    prepped = prepare_params(params, action_features=action_features)  # one-time
    out = jax.block_until_ready(resblock_fc_forward(x, prepped, action=action))
    ref = _reference(x, params, action=action)
    assert out.shape == (batch, out_features)
    assert jnp.allclose(out, ref, atol=2e-3, rtol=2e-3), "mismatch (with action)"

    # Path 2: without action.
    params2 = make_params(kp2, state_features, hidden_features, out_features)
    prepped2 = prepare_params(params2)                                  # one-time
    out2 = jax.block_until_ready(resblock_fc_forward(x, prepped2))
    ref2 = _reference(x, params2)
    assert out2.shape == (batch, out_features)
    assert jnp.allclose(out2, ref2, atol=2e-3, rtol=2e-3), "mismatch (no action)"

    print("KERNEL_OK")
</pallas_src>

<mosaic_0001>
module attributes {stable_mosaic.version = 11 : i64} {
  func.func @_kernel_with_action(%arg0: i32, %arg1: memref<8x24xf32, #tpu.memory_space<vmem>>, %arg2: memref<8x8xf32, #tpu.memory_space<vmem>>, %arg3: memref<24x256xf32, #tpu.memory_space<vmem>>, %arg4: memref<8x256xf32, #tpu.memory_space<vmem>>, %arg5: memref<1x128xf32, #tpu.memory_space<vmem>>, %arg6: memref<128x128xf32, #tpu.memory_space<vmem>>, %arg7: memref<1x128xf32, #tpu.memory_space<vmem>>, %arg8: memref<8x128xf32, #tpu.memory_space<vmem>>) attributes {dimension_semantics = [#tpu.dimension_semantics<parallel>], iteration_bounds = array<i64: 1>, scalar_prefetch = 0 : i64, scratch_operands = 0 : i64, tpu.core_type = #tpu.core_type<tc>, window_params = [{transform_indices = @transform_0, window_bounds = array<i64: 8, 24>}, {transform_indices = @transform_1, window_bounds = array<i64: 8, 8>}, {pipeline_mode = #tpu.pipeline_mode<synchronous>, transform_indices = @transform_2, window_bounds = array<i64: 24, 256>}, {pipeline_mode = #tpu.pipeline_mode<synchronous>, transform_indices = @transform_3, window_bounds = array<i64: 8, 256>}, {pipeline_mode = #tpu.pipeline_mode<synchronous>, transform_indices = @transform_4, window_bounds = array<i64: 1, 128>}, {pipeline_mode = #tpu.pipeline_mode<synchronous>, transform_indices = @transform_5, window_bounds = array<i64: 128, 128>}, {pipeline_mode = #tpu.pipeline_mode<synchronous>, transform_indices = @transform_6, window_bounds = array<i64: 1, 128>}, {transform_indices = @transform_7, window_bounds = array<i64: 8, 128>}]} {
    %c0 = arith.constant 0 : index
    %c0_0 = arith.constant 0 : index
    %0 = vector.load %arg1[%c0, %c0_0] : memref<8x24xf32, #tpu.memory_space<vmem>>, vector<8x24xf32>
    %c0_1 = arith.constant 0 : index
    %c0_2 = arith.constant 0 : index
    %1 = vector.load %arg3[%c0_1, %c0_2] : memref<24x256xf32, #tpu.memory_space<vmem>>, vector<24x256xf32>
    %cst = arith.constant dense<0.000000e+00> : vector<8x256xf32>
    %2 = tpu.matmul %0, %1, %cst {dimension_numbers = #tpu.dot_dimension_numbers<[1], [0], [0], [1], [0, 0, 1, 1], [], []>} : vector<8x24xf32>, vector<24x256xf32>, vector<8x256xf32> -> vector<8x256xf32>
    %c0_3 = arith.constant 0 : index
    %c0_4 = arith.constant 0 : index
    %3 = vector.load %arg2[%c0_3, %c0_4] : memref<8x8xf32, #tpu.memory_space<vmem>>, vector<8x8xf32>
    %c0_5 = arith.constant 0 : index
    %c0_6 = arith.constant 0 : index
    %4 = vector.load %arg4[%c0_5, %c0_6] : memref<8x256xf32, #tpu.memory_space<vmem>>, vector<8x256xf32>
    %cst_7 = arith.constant dense<0.000000e+00> : vector<8x256xf32>
    %5 = tpu.matmul %3, %4, %cst_7 {dimension_numbers = #tpu.dot_dimension_numbers<[1], [0], [0], [1], [0, 0, 1, 1], [], []>} : vector<8x8xf32>, vector<8x256xf32>, vector<8x256xf32> -> vector<8x256xf32>
    %6 = arith.addf %2, %5 : vector<8x256xf32>
    %7 = vector.extract_strided_slice %6 {offsets = [0, 0], sizes = [8, 128], strides = [1, 1]} : vector<8x256xf32> to vector<8x128xf32>
    %c0_8 = arith.constant 0 : index
    %c0_9 = arith.constant 0 : index
    %8 = vector.load %arg5[%c0_8, %c0_9] : memref<1x128xf32, #tpu.memory_space<vmem>>, vector<1x128xf32>
    %9 = vector.broadcast %8 : vector<1x128xf32> to vector<8x128xf32>
    %10 = arith.addf %7, %9 : vector<8x128xf32>
    %cst_10 = arith.constant 0.000000e+00 : f32
    %11 = vector.broadcast %cst_10 : f32 to vector<8x128xf32>
    %12 = arith.maximumf %10, %11 : vector<8x128xf32>
    %13 = vector.extract_strided_slice %6 {offsets = [0, 128], sizes = [8, 128], strides = [1, 1]} : vector<8x256xf32> to vector<8x128xf32>
    %c0_11 = arith.constant 0 : index
    %c0_12 = arith.constant 0 : index
    %14 = vector.load %arg6[%c0_11, %c0_12] : memref<128x128xf32, #tpu.memory_space<vmem>>, vector<128x128xf32>
    %cst_13 = arith.constant dense<0.000000e+00> : vector<8x128xf32>
    %15 = tpu.matmul %12, %14, %cst_13 {dimension_numbers = #tpu.dot_dimension_numbers<[1], [0], [0], [1], [0, 0, 1, 1], [], []>} : vector<8x128xf32>, vector<128x128xf32>, vector<8x128xf32> -> vector<8x128xf32>
    %c0_14 = arith.constant 0 : index
    %c0_15 = arith.constant 0 : index
    %16 = vector.load %arg7[%c0_14, %c0_15] : memref<1x128xf32, #tpu.memory_space<vmem>>, vector<1x128xf32>
    %17 = vector.broadcast %16 : vector<1x128xf32> to vector<8x128xf32>
    %18 = arith.addf %15, %17 : vector<8x128xf32>
    %19 = arith.addf %18, %13 : vector<8x128xf32>
    %c0_16 = arith.constant 0 : index
    %c0_17 = arith.constant 0 : index
    %20 = vector.load %arg8[%c0_16, %c0_17] : memref<8x128xf32, #tpu.memory_space<vmem>>, vector<8x128xf32>
    tpu.vector_store %arg8[%c0_16, %c0_17], %19 {strides = array<i32>} : memref<8x128xf32, #tpu.memory_space<vmem>>, vector<8x128xf32>,
    return
  }
  func.func @transform_0(%arg0: i32) -> (i32, i32) {
    %c0_i32 = arith.constant 0 : i32
    %c0_i32_0 = arith.constant 0 : i32
    return %arg0, %c0_i32 : i32, i32
  }
  func.func @transform_1(%arg0: i32) -> (i32, i32) {
    %c0_i32 = arith.constant 0 : i32
    %c0_i32_0 = arith.constant 0 : i32
    return %arg0, %c0_i32 : i32, i32
  }
  func.func @transform_2(%arg0: i32) -> (i32, i32) {
    %c0_i32 = arith.constant 0 : i32
    %c0_i32_0 = arith.constant 0 : i32
    %c0_i32_1 = arith.constant 0 : i32
    return %c0_i32, %c0_i32_0 : i32, i32
  }
  func.func @transform_3(%arg0: i32) -> (i32, i32) {
    %c0_i32 = arith.constant 0 : i32
    %c0_i32_0 = arith.constant 0 : i32
    %c0_i32_1 = arith.constant 0 : i32
    return %c0_i32, %c0_i32_0 : i32, i32
  }
  func.func @transform_4(%arg0: i32) -> (i32, i32) {
    %c0_i32 = arith.constant 0 : i32
    %c0_i32_0 = arith.constant 0 : i32
    %c0_i32_1 = arith.constant 0 : i32
    return %c0_i32, %c0_i32_0 : i32, i32
  }
  func.func @transform_5(%arg0: i32) -> (i32, i32) {
    %c0_i32 = arith.constant 0 : i32
    %c0_i32_0 = arith.constant 0 : i32
    %c0_i32_1 = arith.constant 0 : i32
    return %c0_i32, %c0_i32_0 : i32, i32
  }
  func.func @transform_6(%arg0: i32) -> (i32, i32) {
    %c0_i32 = arith.constant 0 : i32
    %c0_i32_0 = arith.constant 0 : i32
    %c0_i32_1 = arith.constant 0 : i32
    return %c0_i32, %c0_i32_0 : i32, i32
  }
  func.func @transform_7(%arg0: i32) -> (i32, i32) {
    %c0_i32 = arith.constant 0 : i32
    %c0_i32_0 = arith.constant 0 : i32
    return %arg0, %c0_i32 : i32, i32
  }
}

</mosaic_0001>

<bundles_post_ra>
// kernel: tpu_custom_call.1
= control target key start
LH: loop header
LB: loop body
LE: loop exit
PB: predicated region body
PF: predicated region fallthrough
CT: control target
= control target key end

     0   :  { %12 = vsyncpa [#allocation3], 0  ;;  %s661_s0 = inlined_call_operand.hbm [shape: f32[8,24], index: 0, kind: input, shape index: {}]   ;;  %s662_s1 = inlined_call_operand.hbm [shape: f32[8,8], index: 1, kind: input, shape index: {}]   ;;  %s663_s2 = inlined_call_operand.hbm [shape: f32[24,256], index: 2, kind: input, shape index: {}]   ;;  %s664_s3 = inlined_call_operand.hbm [shape: f32[8,256], index: 3, kind: input, shape index: {}]   ;;  %s665_s4 = inlined_call_operand.vmem [shape: f32[1,128], index: 4, kind: input, shape index: {}]   ;;  %s666_s5 = inlined_call_operand.hbm [shape: f32[128,128], index: 5, kind: input, shape index: {}]   ;;  %s667_s6 = inlined_call_operand.vmem [shape: f32[1,128], index: 6, kind: input, shape index: {}]   ;;  %s668_s7 = inlined_call_operand.hbm [shape: f32[8,128], index: 7, kind: output, shape index: {}]  }
   0x1   :  { %13 = vsyncpa [#allocation6], 0 }
   0x2   :  { %14 = vsyncpa [#allocation9], 0 }
   0x3   :  { %15 = vsyncpa [#allocation4], 0  ;;  %s566_s24 = smov [#allocation5]   ;;  %s567_s26 = smov [#allocation8]  }
   0x4   :  { %s32_s25 = sshll.u32 %s566_s24, 4  ;;  %s54_s27 = sshll.u32 %s567_s26, 4  ;;  %s33_s25 = int_to_ptr.vmem [resolvable:$true] %s32_s25  ;;  %s55_s27 = int_to_ptr.vmem [resolvable:$true] %s54_s27 }
   0x5   :  { %s446_s28 = scalar_lea.vmem %s33_s25, 128  ;;  %p451_p1 = scmp.lt.s32.totalorder %s33_s25, %s33_s25 }
   0x6   :  { %p447_p0 = scmp.ne.s32.totalorder %s33_s25, %s446_s28  ;;  %p452_p2 = scmp.lt.s32.totalorder %s446_s28, %s446_s28 }
   0x8   :  { %p453_p3 = por %p452_p2, %p451_p1 }
   0xa   :  { %p454_p4 = pnand %p453_p3, %p447_p0 }
   0xc   :  { %457 = shalt.err (!%p454_p4)
}
   0xd   :  { %35 = dma.hbm_to_vmem [thread:$0]  %s662_s1, 128, %s33_s25, [#allocation6]  }
   0xe   :  { %s466_s8 = scalar_lea.vmem %s55_s27, 256  ;;  %p471_p6 = scmp.lt.s32.totalorder %s55_s27, %s55_s27 }
   0xf   :  { %p467_p5 = scmp.ne.s32.totalorder %s55_s27, %s466_s8  ;;  %p472_p7 = scmp.lt.s32.totalorder %s466_s8, %s466_s8 }
  0x11   :  { %p473_p8 = por %p472_p7, %p471_p6 }
  0x13   :  { %p474_p9 = pnand %p473_p8, %p467_p5 }
  0x15   :  { %477 = shalt.err (!%p474_p9)
}
  0x16   :  { %57 = dma.hbm_to_vmem [thread:$0]  %s664_s3, 256, %s55_s27, [#allocation9]  }
  0x17   :  { %s568_s11 = smov [#allocation2]   ;;  %s569_s13 = smov [#allocation7]  }
  0x18   :  { %s22_s12 = sshll.u32 %s568_s11, 4  ;;  %s41_s14 = sshll.u32 %s569_s13, 4  ;;  %s23_s12 = int_to_ptr.vmem [resolvable:$true] %s22_s12  ;;  %s42_s14 = int_to_ptr.vmem [resolvable:$true] %s41_s14 }
  0x19   :  { %s486_s15 = scalar_lea.vmem %s23_s12, 128  ;;  %p491_p11 = scmp.lt.s32.totalorder %s23_s12, %s23_s12 }
  0x1a   :  { %p487_p10 = scmp.ne.s32.totalorder %s23_s12, %s486_s15  ;;  %p492_p12 = scmp.lt.s32.totalorder %s486_s15, %s486_s15 }
  0x1c   :  { %p493_p13 = por %p492_p12, %p491_p11 }
  0x1e   :  { %p494_p0 = pnand %p493_p13, %p487_p10 }
  0x20   :  { %497 = shalt.err (!%p494_p0)
}
  0x21   :  { %25 = dma.hbm_to_vmem [thread:$0]  %s661_s0, 128, %s23_s12, [#allocation3]  }
  0x22   :  { %s506_s17 = scalar_lea.vmem %s42_s14, 768  ;;  %p511_p2 = scmp.lt.s32.totalorder %s42_s14, %s42_s14 }
  0x23   :  { %p507_p1 = scmp.ne.s32.totalorder %s42_s14, %s506_s17  ;;  %p512_p3 = scmp.lt.s32.totalorder %s506_s17, %s506_s17 }
  0x25   :  { %p513_p4 = por %p512_p3, %p511_p2 }
  0x27   :  { %p514_p5 = pnand %p513_p4, %p507_p1 }
  0x29   :  { %517 = shalt.err (!%p514_p5)
}
  0x2a   :  { %s570_s3 = smov 256   ;;  %s571_s18 = smov 16  }
  0x2b   :  { %47 = dma.hbm_to_vmem [thread:$0]  %s663_s2, 768, %s42_s14, [#allocation6], %s570_s3, %s570_s3, %s571_s18  }
  0x2c   :  { %s572_s21 = smov [#allocation10]  }
  0x2d   :  { %s65_s22 = sshll.u32 %s572_s21, 4  ;;  %s66_s22 = int_to_ptr.vmem [resolvable:$true] %s65_s22 }
  0x2e   :  { %s526_s23 = scalar_lea.vmem %s66_s22, 2048  ;;  %p531_p7 = scmp.lt.s32.totalorder %s66_s22, %s66_s22 }
  0x2f   :  { %p527_p6 = scmp.ne.s32.totalorder %s66_s22, %s526_s23  ;;  %p532_p8 = scmp.lt.s32.totalorder %s526_s23, %s526_s23 }
  0x31   :  { %p533_p9 = por %p532_p8, %p531_p7 }
  0x33   :  { %p534_p10 = pnand %p533_p9, %p527_p6 }
  0x35   :  { %537 = shalt.err (!%p534_p10)
}
  0x36   :  { %s573_s0 = smov 128   ;;  %s574_s24 = smov 8  }
  0x37   :  { %71 = dma.hbm_to_vmem [thread:$0]  %s666_s5, 2048, %s66_s22, [#allocation9], %s573_s0, %s573_s0, %s574_s24  }
  0x38   :  { %558 = dma.done.wait [#allocation3], 128  }
  0x39   :  { %559 = vsyncadd [#allocation3], 4294967168 }
  0x3a   :  { %560 = dma.done.wait [#allocation6], 896  }
  0x3b   :  { %561 = vsyncadd [#allocation6], 4294966400 }
  0x3c   :  { %562 = dma.done.wait [#allocation9], 2304  }
  0x3d   :  { %563 = vsyncadd [#allocation9], 4294964992  ;;  %v575_v0 = vmov 0.0   ;;  %v98_v1 = vld [vmem:[#allocation8 + $0x8] sm:$0xff]  ;;  %v97_v2 = vld [vmem:[#allocation8] sm:$0xff]  ;;  %vm99_vm0 = vcmask 64512  }
  0x3e   :  { %167 = vmatprep.mubr.f32.mxu1 %v575_v0  ;;  %391 = vmatprep.subr.mxu0 %v575_v0  ;;  %v96_v3 = vld [vmem:[#allocation5] sm:$0xff]  ;;  %v95_v4 = vld [vmem:[#allocation7 + $0x28] sm:$0xff]  ;;  %v94_v5 = vld [vmem:[#allocation7 + $0x20] sm:$0xff]  ;;  %vm174_vm1 = vcmask 195584   ;;  %vm576_vm2 = vmmov 0   ;;  %s577_s29 = smov [#allocation11]  }
  0x3f   :  { %133 = vmatprep.subr.mxu1 %v98_v1  ;;  %v93_v6 = vld [vmem:[#allocation7 + $0x18] sm:$0xff]  ;;  %v92_v7 = vld [vmem:[#allocation7 + $0x10] sm:$0xff]  ;;  %v91_v9 = vld [vmem:[#allocation7 + $0x8] sm:$0xff]  ;;  %423 = vmatprep.mubr.msk.f32.mxu0 %vm576_vm2, %v575_v0  ;;  %s359_s30 = sshll.u32 %s577_s29, 4  ;;  %s360_s30 = int_to_ptr.vmem [resolvable:$true] %s359_s30 }
  0x40   :  { %134 = vmatpush1.msra.mxu1 %v97_v2  ;;  %v273_v8 = vld [vmem:[#allocation10 + $0x78] sm:$0xff]  ;;  %v272_v10 = vld [vmem:[#allocation10 + $0x70] sm:$0xff]  ;;  %v90_v11 = vld [vmem:[#allocation7] sm:$0xff]  ;;  %s538_s8 = scalar_lea.vmem %s360_s30, 128  ;;  %p543_p12 = scmp.lt.s32.totalorder %s360_s30, %s360_s30 }
  0x41   :  { %370 = vmatmul.mubr.msk.f32.vlgmr.msra.gmra.mxu1 %vm99_vm0, %v96_v3  ;;  %204 = vmatprep.subr.mxu1 %v95_v4  ;;  %v89_v12 = vld [vmem:[#allocation2] sm:$0xff]  ;;  %v271_v13 = vld [vmem:[#allocation10 + $0x68] sm:$0xff]  ;;  %v270_v14 = vld [vmem:[#allocation10 + $0x60] sm:$0xff]  ;;  %p539_p11 = scmp.ne.s32.totalorder %s360_s30, %s538_s8  ;;  %p544_p13 = scmp.lt.s32.totalorder %s538_s8, %s538_s8 }
  0x42   :  { %205 = vmatpush1.msra.mxu1 %v94_v5  ;;  %242 = vmatprep.mubr.f32.mxu1 %v575_v0  ;;  %v269_v15 = vld [vmem:[#allocation10 + $0x58] sm:$0xff]  ;;  %v268_v16 = vld [vmem:[#allocation10 + $0x50] sm:$0xff]  ;;  %v267_v17 = vld [vmem:[#allocation10 + $0x48] sm:$0xff] }
  0x43   :  { %206 = vmatprep.subr.mxu1 %v93_v6  ;;  %392 = vmatpush3.msra.mxu0 %v273_v8  ;;  %v266_v18 = vld [vmem:[#allocation10 + $0x40] sm:$0xff]  ;;  %v265_v19 = vld [vmem:[#allocation10 + $0x38] sm:$0xff]  ;;  %v264_v20 = vld [vmem:[#allocation10 + $0x30] sm:$0xff]  ;;  %p545_p0 = por %p544_p13, %p543_p12 }
  0x44   :  { %207 = vmatpush1.msra.mxu1 %v92_v7  ;;  %393 = vmatprep.subr.mxu0 %v575_v0  ;;  %v263_v21 = vld [vmem:[#allocation10 + $0x28] sm:$0xff]  ;;  %v262_v22 = vld [vmem:[#allocation10 + $0x20] sm:$0xff]  ;;  %v261_v23 = vld [vmem:[#allocation10 + $0x18] sm:$0xff] }
  0x45   :  { %208 = vmatprep.subr.mxu1 %v91_v9  ;;  %394 = vmatpush3.msra.mxu0 %v272_v10  ;;  %v260_v24 = vld [vmem:[#allocation10 + $0x10] sm:$0xff]  ;;  %v259_v25 = vld [vmem:[#allocation10 + $0x8] sm:$0xff]  ;;  %v258_v26 = vld [vmem:[#allocation10] sm:$0xff]  ;;  %p546_p1 = pnand %p545_p0, %p539_p11 }
  0x46   :  { %209 = vmatpush1.msra.mxu1 %v90_v11  ;;  %395 = vmatprep.subr.mxu0 %v575_v0  ;;  %v372_v30 = vld [vmem:[%s665_s4] ss:$0 sm:$0xff] }
  0x47   :  { %371 = vmatmul.mubr.msk.f32.vlgmr.msra.gmra.mxu1 %vm174_vm1, %v89_v12  ;;  %396 = vmatpush3.msra.mxu0 %v271_v13  ;;  %v373_v35 = vld [vmem:[%s667_s6] ss:$0 sm:$0xff] }
  0x48   :  { %397 = vmatprep.subr.mxu0 %v575_v0 }
  0x49   :  { %398 = vmatpush3.msra.mxu0 %v270_v14 }
  0x4a   :  { %399 = vmatprep.subr.mxu0 %v575_v0 }
  0x4b   :  { %400 = vmatpush3.msra.mxu0 %v269_v15 }
  0x4c   :  { %401 = vmatprep.subr.mxu0 %v575_v0 }
  0x4d   :  { %402 = vmatpush3.msra.mxu0 %v268_v16 }
  0x4e   :  { %403 = vmatprep.subr.mxu0 %v575_v0 }
  0x4f   :  { %404 = vmatpush3.msra.mxu0 %v267_v17 }
  0x50   :  { %405 = vmatprep.subr.mxu0 %v575_v0 }
  0x51   :  { %406 = vmatpush3.msra.mxu0 %v266_v18 }
  0x52   :  { %407 = vmatprep.subr.mxu0 %v575_v0 }
  0x53   :  { %408 = vmatpush3.msra.mxu0 %v265_v19 }
  0x54   :  { %409 = vmatprep.subr.mxu0 %v575_v0 }
  0x55   :  { %410 = vmatpush3.msra.mxu0 %v264_v20 }
  0x56   :  { %411 = vmatprep.subr.mxu0 %v575_v0 }
  0x57   :  { %412 = vmatpush3.msra.mxu0 %v263_v21 }
  0x58   :  { %413 = vmatprep.subr.mxu0 %v575_v0 }
  0x59   :  { %414 = vmatpush3.msra.mxu0 %v262_v22 }
  0x5a   :  { %415 = vmatprep.subr.mxu0 %v575_v0 }
  0x5b   :  { %416 = vmatpush3.msra.mxu0 %v261_v23 }
  0x5c   :  { %417 = vmatprep.subr.mxu0 %v575_v0 }
  0x5d   :  { %418 = vmatpush3.msra.mxu0 %v260_v24 }
  0x5e   :  { %419 = vmatprep.subr.mxu0 %v575_v0 }
  0x5f   :  { %420 = vmatpush3.msra.mxu0 %v259_v25 }
  0x60   :  { %421 = vmatprep.subr.mxu0 %v575_v0 }
  0x61   :  { %422 = vmatpush3.msra.mxu0 %v258_v26 }
 0x101   :  { %v169_v27 = vpop.f32.mrf.mxu1 }
 0x103   :  { %v171_v28 = vpop.f32.mrf.mxu1 }
 0x107   :  { %v244_v29 = vpop.f32.mrf.mxu1 }
 0x108   :  { %v245_v31 = vadd.f32 %v244_v29, %v169_v27 }
 0x109   :  { %v246_v34 = vpop.f32.mrf.mxu1 }
 0x10a   :  { %v256_v32 = vadd.f32 %v372_v30, %v245_v31  ;;  %v247_v37 = vadd.f32 %v246_v34, %v171_v28 }
 0x10c   :  { %v257_v33 = vmax.f32 %v256_v32, 0.0 }
 0x10e   :  { %424 = vmatmul.mubr.f32.vlgmr.msra.gmra.mxu0 %v257_v33 }
 0x1ce   :  { %v347_v36 = vpop.f32.mrf.mxu0 }
 0x1cf   :  { %v348_v38 = vadd.f32 %v373_v35, %v347_v36 }
 0x1d0   :  { %v425_v39 = vpop.f32.mrf.mxu0 }
 0x1d1   :  { %v351_v40 = vadd.f32 %v348_v38, %v247_v37 }
 0x1d3   :  { %352 = vst [vmem:[#allocation11] sm:$0xff] %v351_v40 }
 0x1d4   :  { %549 = shalt.err (!%p546_p1)
}
 0x1d5   :  { %362 = dma.vmem_to_hbm [thread:$0]  %s360_s30, 128, %s668_s7, [#allocation4]  }
 0x1d6   :  { %564 = dma.done.wait [#allocation4], 128  }
 0x1d7   :  { %565 = vsyncadd [#allocation4], 4294967168 }
 0x1d8   :  { %366 = vsyncpa [#allocation3], 1 }
 0x1d9   :  { %367 = vsyncpa [#allocation6], 1 }
 0x1da   :  { %368 = vsyncpa [#allocation9], 1 }
 0x1db   :  { %369 = vsyncpa [#allocation4], 1 }

</bundles_post_ra>
